<compile_context>
chip_gen: v5e
topology: v5e:2x2
jax: 0.10.0
libtpu: 0.0.40
codegen_flags: <defaults>
</compile_context>

<pallas_src>
import jax
import jax.numpy as jnp
import numpy as np
from jax.experimental import pallas as pl
from jax.experimental.pallas import tpu as pltpu


def _patch_embed_kernel(p_ref, w_ref, b_ref, o_ref):
    """p: (tm, K) patch rows; w: (K, E); b: (1, E); o: (tm, E)."""
    acc = jnp.dot(p_ref[...], w_ref[...], preferred_element_type=jnp.float32)
    o_ref[...] = (acc + b_ref[...].astype(jnp.float32)).astype(o_ref.dtype)


def _round_up(v, m):
    return -(-v // m) * m


def patch_embed(x, weight, bias, patch_size, *, tm=2048):
    """PatchEmbed forward: Conv3d(stride==kernel) -> flatten(2).transpose(1,2).

    x      : (B, C, T, H, W)
    weight : (E, C, pt, ph, pw)   (PyTorch Conv3d layout)
    bias   : (E,)
    returns: (B, T'*H'*W', E)     (norm_layer=None -> Identity, nothing to apply)
    """
    pt, ph, pw = patch_size
    B, C, T, H, W = x.shape
    E = weight.shape[0]
    assert T % pt == 0 and H % ph == 0 and W % pw == 0, "input must be patch-divisible"
    Tn, Hn, Wn = T // pt, H // ph, W // pw
    K = C * pt * ph * pw
    N = B * Tn * Hn * Wn

    # Keep the model's native dtype end-to-end (bf16 halves HBM traffic on this
    # bandwidth-bound kernel); only the MXU accumulate is forced to f32.
    compute_dtype = jnp.result_type(x.dtype, weight.dtype)

    # --- patchify (layout plumbing; fused into the Pallas input by XLA) ------
    # Row layout (c, kt, kh, kw) matches weight.reshape(E, -1), so the GEMM
    # reproduces the convolution exactly.
    patches = x.reshape(B, C, Tn, pt, Hn, ph, Wn, pw)
    patches = patches.transpose(0, 2, 4, 6, 1, 3, 5, 7)       # (B,Tn,Hn,Wn,C,pt,ph,pw)
    patches = patches.reshape(N, K).astype(compute_dtype)

    w_mat = weight.reshape(E, K).T.astype(compute_dtype)       # (K, E), resident
    b_row = bias.reshape(1, E).astype(compute_dtype)           # (1, E), resident

    # --- row tiling: big tiles, no padding (Pallas masks the ragged tail) ----
    pack = max(8, 32 // np.dtype(compute_dtype).itemsize)      # sublane packing
    if N <= pack:
        tm = N                                                 # one block == full dim
    else:
        # cap tm so the parallel grid has >= 2 blocks (v7x megacore), then snap
        # down to the sublane-pack multiple required for a partial block shape.
        tm = min(tm, _round_up(pl.cdiv(N, 2), pack))
        tm = max(pack, (tm // pack) * pack)
    n_blocks = pl.cdiv(N, tm)

    out = pl.pallas_call(
        _patch_embed_kernel,
        out_shape=jax.ShapeDtypeStruct((N, E), compute_dtype),
        grid_spec=pltpu.PrefetchScalarGridSpec(
            num_scalar_prefetch=0,
            grid=(n_blocks,),
            in_specs=[
                pl.BlockSpec((tm, K), lambda i: (i, 0)),       # patch rows, streamed
                pl.BlockSpec((K, E), lambda i: (0, 0)),        # weight, resident
                pl.BlockSpec((1, E), lambda i: (0, 0)),        # bias, resident
            ],
            out_specs=pl.BlockSpec((tm, E), lambda i: (i, 0)),
        ),
        compiler_params=pltpu.CompilerParams(
            dimension_semantics=("parallel",),                 # megacore sharding
            allow_input_fusion=[True, False, False],           # fuse patchify in
        ),
    )(patches, w_mat, b_row)

    return out.reshape(B, Tn * Hn * Wn, E)


def patch_embed_ref(x, weight, bias, patch_size):
    """Pure-JAX reference mirroring the PyTorch module (Conv3d path)."""
    out = jax.lax.conv_general_dilated(
        x.astype(jnp.float32),
        weight.astype(jnp.float32),
        window_strides=patch_size,
        padding="VALID",
        dimension_numbers=("NCDHW", "OIDHW", "NCDHW"),
    )
    out = out + bias.astype(jnp.float32)[None, :, None, None, None]
    B, E = out.shape[:2]
    return out.reshape(B, E, -1).transpose(0, 2, 1)            # flatten(2).transpose(1,2)


if __name__ == "__main__":
    # Small HunyuanVideo-like shapes: latent video (B, C, T, H, W), patch (1,2,2).
    B, C, T, H, W = 2, 4, 8, 16, 16
    patch_size = (1, 2, 2)
    embed_dim = 128

    key = jax.random.PRNGKey(0)
    kx, kw, kb = jax.random.split(key, 3)

    x = jax.random.normal(kx, (B, C, T, H, W), jnp.float32)

    # xavier_uniform on the flattened (E, C*pt*ph*pw) weight, as in the module.
    fan_in = C * patch_size[0] * patch_size[1] * patch_size[2]
    limit = (6.0 / (fan_in + embed_dim)) ** 0.5
    w = jax.random.uniform(kw, (embed_dim, C) + patch_size, jnp.float32, -limit, limit)
    b = 0.02 * jax.random.normal(kb, (embed_dim,), jnp.float32)

    # f32 path (module default dtype): exact f32 accumulation, tight tolerance.
    out = jax.block_until_ready(patch_embed(x, w, b, patch_size))
    ref = patch_embed_ref(x, w, b, patch_size)
    np.testing.assert_allclose(np.asarray(out), np.asarray(ref), rtol=1e-4, atol=1e-4)

    # bf16 I/O path (half the HBM bytes; MXU still accumulates in f32).
    xb, wb, bb = (a.astype(jnp.bfloat16) for a in (x, w, b))
    out_bf = jax.block_until_ready(patch_embed(xb, wb, bb, patch_size))
    ref_bf = patch_embed_ref(xb.astype(jnp.float32), wb.astype(jnp.float32),
                             bb.astype(jnp.float32), patch_size)
    np.testing.assert_allclose(np.asarray(out_bf.astype(jnp.float32)),
                               np.asarray(ref_bf), rtol=2e-2, atol=2e-2)

    print("KERNEL_OK")
</pallas_src>

<mosaic_0001>
module attributes {stable_mosaic.version = 11 : i64} {
  func.func @_patch_embed_kernel(%arg0: i32, %arg1: memref<512x16xf32, #tpu.memory_space<vmem>>, %arg2: memref<16x128xf32, #tpu.memory_space<vmem>>, %arg3: memref<1x128xf32, #tpu.memory_space<vmem>>, %arg4: memref<512x128xf32, #tpu.memory_space<vmem>>) attributes {dimension_semantics = [#tpu.dimension_semantics<parallel>], iteration_bounds = array<i64: 2>, scalar_prefetch = 0 : i64, scratch_operands = 0 : i64, tpu.core_type = #tpu.core_type<tc>, window_params = [{transform_indices = @transform_0, window_bounds = array<i64: 512, 16>}, {pipeline_mode = #tpu.pipeline_mode<synchronous>, transform_indices = @transform_1, window_bounds = array<i64: 16, 128>}, {pipeline_mode = #tpu.pipeline_mode<synchronous>, transform_indices = @transform_2, window_bounds = array<i64: 1, 128>}, {transform_indices = @transform_3, window_bounds = array<i64: 512, 128>}]} {
    %c0 = arith.constant 0 : index
    %c0_0 = arith.constant 0 : index
    %0 = vector.load %arg1[%c0, %c0_0] : memref<512x16xf32, #tpu.memory_space<vmem>>, vector<512x16xf32>
    %c0_1 = arith.constant 0 : index
    %c0_2 = arith.constant 0 : index
    %1 = vector.load %arg2[%c0_1, %c0_2] : memref<16x128xf32, #tpu.memory_space<vmem>>, vector<16x128xf32>
    %cst = arith.constant dense<0.000000e+00> : vector<512x128xf32>
    %2 = tpu.matmul %0, %1, %cst {dimension_numbers = #tpu.dot_dimension_numbers<[1], [0], [0], [1], [0, 0, 1, 1], [], []>} : vector<512x16xf32>, vector<16x128xf32>, vector<512x128xf32> -> vector<512x128xf32>
    %c0_3 = arith.constant 0 : index
    %c0_4 = arith.constant 0 : index
    %3 = vector.load %arg3[%c0_3, %c0_4] : memref<1x128xf32, #tpu.memory_space<vmem>>, vector<1x128xf32>
    %4 = vector.broadcast %3 : vector<1x128xf32> to vector<512x128xf32>
    %5 = arith.addf %2, %4 : vector<512x128xf32>
    %c0_5 = arith.constant 0 : index
    %c0_6 = arith.constant 0 : index
    %6 = vector.load %arg4[%c0_5, %c0_6] : memref<512x128xf32, #tpu.memory_space<vmem>>, vector<512x128xf32>
    tpu.vector_store %arg4[%c0_5, %c0_6], %5 {strides = array<i32>} : memref<512x128xf32, #tpu.memory_space<vmem>>, vector<512x128xf32>,
    return
  }
  func.func @transform_0(%arg0: i32) -> (i32, i32) {
    %c0_i32 = arith.constant 0 : i32
    %c0_i32_0 = arith.constant 0 : i32
    return %arg0, %c0_i32 : i32, i32
  }
  func.func @transform_1(%arg0: i32) -> (i32, i32) {
    %c0_i32 = arith.constant 0 : i32
    %c0_i32_0 = arith.constant 0 : i32
    %c0_i32_1 = arith.constant 0 : i32
    return %c0_i32, %c0_i32_0 : i32, i32
  }
  func.func @transform_2(%arg0: i32) -> (i32, i32) {
    %c0_i32 = arith.constant 0 : i32
    %c0_i32_0 = arith.constant 0 : i32
    %c0_i32_1 = arith.constant 0 : i32
    return %c0_i32, %c0_i32_0 : i32, i32
  }
  func.func @transform_3(%arg0: i32) -> (i32, i32) {
    %c0_i32 = arith.constant 0 : i32
    %c0_i32_0 = arith.constant 0 : i32
    return %arg0, %c0_i32 : i32, i32
  }
}

</mosaic_0001>

<bundles_post_ra>
// kernel: tpu_custom_call.1
= control target key start
LH: loop header
LB: loop body
LE: loop exit
PB: predicated region body
PF: predicated region fallthrough
CT: control target
= control target key end

     0   :  { %8 = vsyncpa [#allocation3], 0  ;;  %s1357_s0 = inlined_call_operand.vmem [shape: f32[1024,16], index: 0, kind: input, shape index: {}]   ;;  %s1358_s1 = inlined_call_operand.vmem [shape: f32[16,128], index: 1, kind: input, shape index: {}]   ;;  %s1359_s2 = inlined_call_operand.vmem [shape: f32[1,128], index: 2, kind: input, shape index: {}]   ;;  %s1360_s3 = inlined_call_operand.hbm [shape: f32[1024,128], index: 3, kind: output, shape index: {}]  }
   0x1   :  { %10 = vsyncpa [#allocation3 + $0x1], 0  ;;  %s997_s12 = smov 0   ;;  %s999_s13 = smov 0  }
   0x2   :  { %s1001_s14 = smov 0   ;;  %s1003_s15 = smov 0  }
   0x3 LB: > { %s1018_s16 = sadd.s32 4294967295, %s973_s15   ;;  %s786_s17 = sadd.s32 4294967294, %s973_s15   ;;  %s973_s15 = sphi %s1003_s15, %s1366_s15   ;;  %s969_s14 = sphi %s1001_s14, %s1365_s14   ;;  %s965_s13 = sphi %s999_s13, %s1364_s13   ;;  %s961_s12 = sphi %s997_s12, %s1363_s12  }
   0x4   : > { %s1022_s18 = sadd.s32 1, %s973_s15   ;;  %s91_s19 = sadd.s32 1, %s969_s14 }
   0x5   : > { %s88_s20 = ssub.s32 %s973_s15, %s1022_s18  ;;  %p101_p0 = scmp.ne.s32.totalorder %s969_s14, %s965_s13 }
   0x6   : > { %p89_p1 = scmp.eq.s32.totalorder %s88_s20, 0  ;;  %p102_p2 = scmp.eq.s32.totalorder %s1018_s16, 1 }
   0x7   : > { %p107_p3 = scmp.ne.s32.totalorder %s965_s13, %s961_s12  ;;  %p108_p4 = scmp.eq.s32.totalorder %s786_s17, 1 }
   0x8   : > { %s1033_s21 = scalar_select %p89_p1, %s969_s14, %s91_s19  }
   0x9   : > { %p1035_p5 = por %p102_p2, %p101_p0  ;;  %p1039_p6 = por %p108_p4, %p107_p3 }
   0xa   : > { %p789_p7 = scmp.ge.s32.totalorder %s973_s15, 1  ;;  %p141_p8 = scmp.lt.s32.totalorder %s973_s15, 3 }
   0xc   : > { %p142_p9 = pnand %p789_p7, %p141_p8 }
   0xd   : > { %s791_s28 = sshll.u32 (!%p142_p9), %s1018_s16, 6  ;;  %s162_s6 = sand.u32 (!%p142_p9), 1, %s965_s13  }
   0xe   : > { %145 = sbr.rel (%p142_p9) target bundleno = 283 (0x11b), region = 32  ;;  %p166_p10 = scmp.lt.s32.totalorder (!%p142_p9), %s791_s28, 127 }
   0xf   : > { %s790_s7 = sshll.u32 (!%p142_p9), %s162_s6, 9  ;;  %s862_s11 = sshll.u32 (!%p142_p9), %s1018_s16, 9 }
  0x10   : > { %s1195_s10 = scalar_lea.vmem (!%p142_p9), [#allocation2], %s790_s7  ;;  %s720_s20 = scalar_lea.hbm (!%p142_p9), %s1360_s3, %s862_s11 }
  0x11   : > { %s721_s16 = sshll.u32 (!%p142_p9), %s1195_s10, 4  ;;  %s723_s24 = sshll.u32 (!%p142_p9), %s720_s20, 4  ;;  %s722_s16 = int_to_ptr.vmem [resolvable:$true] %s721_s16  ;;  %s724_s24 = int_to_ptr.hbm [resolvable:$true] %s723_s24 }
  0x12   : > { %s709_s25 = scalar_lea.sflag (!%p142_p9), [#allocation3], %s162_s6  ;;  %s925_s26 = sshra.s32 (!%p142_p9), %s724_s24, 4  ;;  %s926_s26 = int_to_ptr.hbm [resolvable:$true] %s925_s26 }
  0x13   : > { %v237_v0 = vld [vmem:[%s1358_s1 + $0x8] sm:$0xff]  ;;  %v236_v1 = vld [vmem:[%s1358_s1] sm:$0xff]  ;;  %s1368_s28 = smov (!%p166_p10, %s791_s28), 127  ;;  %vm242_vm0 = vcmask 130048   ;;  %s927_s27 = scalar_lea.hbm %s926_s26, 512 }
  0x14   : > { %864 = vmatpush.msra.mxu2 %v237_v0  ;;  %865 = vmatpush.msra.mxu3 %v237_v0  ;;  %s792_s29 = sshll.u32 %s1368_s28, 3  ;;  %p928_p11 = scmp.ne.s32.totalorder %s926_s26, %s927_s27 }
  0x15   : > { %449 = vmatpush.msra.mxu0 %v237_v0  ;;  %863 = vmatpush.msra.mxu1 %v237_v0  ;;  %s1055_s5 = scalar_lea.vmem %s1357_s0, %s792_s29  ;;  %s931_s30 = scalar_lea.hbm %s1360_s3, 1024 }
  0x16   : > { %867 = vmatpush.msra.mxu2 %v236_v1  ;;  %868 = vmatpush.msra.mxu3 %v236_v1  ;;  %v204_v2 = vld [vmem:[%s1055_s5 + $0x100] sm:$0xff]  ;;  %v205_v6 = vld [vmem:[%s1055_s5 + $0x108] sm:$0xff]  ;;  %v206_v10 = vld [vmem:[%s1055_s5 + $0x110] sm:$0xff]  ;;  %p929_p12 = pnand %p928_p11, %p1035_p5  ;;  %p932_p0 = scmp.lt.s32.totalorder %s926_s26, %s1360_s3 }
  0x17   : > { %450 = vmatpush.msra.mxu0 %v236_v1  ;;  %866 = vmatpush.msra.mxu1 %v236_v1  ;;  %v220_v3 = vld [vmem:[%s1055_s5 + $0x180] sm:$0xff]  ;;  %v221_v7 = vld [vmem:[%s1055_s5 + $0x188] sm:$0xff]  ;;  %v222_v11 = vld [vmem:[%s1055_s5 + $0x190] sm:$0xff]  ;;  %p933_p1 = scmp.lt.s32.totalorder %s931_s30, %s927_s27 }
  0x18   : > { %v172_v4 = vld [vmem:[%s1055_s5] sm:$0xff]  ;;  %825 = vmatmul.msk.f32.vlgmr.msra.gmra.mxu2 %vm242_vm0, %v204_v2  ;;  %841 = vmatmul.msk.f32.vlgmr.msra.gmra.mxu3 %vm242_vm0, %v220_v3  ;;  %v173_v8 = vld [vmem:[%s1055_s5 + $0x8] sm:$0xff]  ;;  %v174_v12 = vld [vmem:[%s1055_s5 + $0x10] sm:$0xff]  ;;  %p930_p13 = pneg %p929_p12 }
  0x19   : > { %v188_v5 = vld [vmem:[%s1055_s5 + $0x80] sm:$0xff]  ;;  %793 = vmatmul.msk.f32.vlgmr.msra.gmra.mxu0 %vm242_vm0, %v172_v4  ;;  %v189_v9 = vld [vmem:[%s1055_s5 + $0x88] sm:$0xff]  ;;  %v190_v13 = vld [vmem:[%s1055_s5 + $0x90] sm:$0xff]  ;;  %p934_p2 = por %p933_p1, %p932_p0 }
  0x1a   : > { %809 = vmatmul.msk.f32.vlgmr.msra.gmra.mxu1 %vm242_vm0, %v188_v5  ;;  %v207_v14 = vld [vmem:[%s1055_s5 + $0x118] sm:$0xff]  ;;  %v208_v18 = vld [vmem:[%s1055_s5 + $0x120] sm:$0xff]  ;;  %v209_v22 = vld [vmem:[%s1055_s5 + $0x128] sm:$0xff] }
  0x1b   : > { %v223_v15 = vld [vmem:[%s1055_s5 + $0x198] sm:$0xff]  ;;  %v224_v19 = vld [vmem:[%s1055_s5 + $0x1a0] sm:$0xff]  ;;  %v225_v23 = vld [vmem:[%s1055_s5 + $0x1a8] sm:$0xff]  ;;  %p935_p3 = pnand %p934_p2, %p930_p13 }
  0x1c   : > { %v175_v16 = vld [vmem:[%s1055_s5 + $0x18] sm:$0xff]  ;;  %v176_v20 = vld [vmem:[%s1055_s5 + $0x20] sm:$0xff]  ;;  %v177_v24 = vld [vmem:[%s1055_s5 + $0x28] sm:$0xff] }
  0x1d   : > { %v191_v17 = vld [vmem:[%s1055_s5 + $0x98] sm:$0xff]  ;;  %v192_v21 = vld [vmem:[%s1055_s5 + $0xa0] sm:$0xff]  ;;  %v193_v25 = vld [vmem:[%s1055_s5 + $0xa8] sm:$0xff] }
  0x1e   : > { %v210_v26 = vld [vmem:[%s1055_s5 + $0x130] sm:$0xff]  ;;  %v211_v30 = vld [vmem:[%s1055_s5 + $0x138] sm:$0xff]  ;;  %v212_v34 = vld [vmem:[%s1055_s5 + $0x140] sm:$0xff] }
  0x1f   : > { %v226_v27 = vld [vmem:[%s1055_s5 + $0x1b0] sm:$0xff]  ;;  %v227_v31 = vld [vmem:[%s1055_s5 + $0x1b8] sm:$0xff]  ;;  %v228_v35 = vld [vmem:[%s1055_s5 + $0x1c0] sm:$0xff] }
  0x20   : > { %826 = vmatmul.msk.f32.gmra.mxu2 %vm242_vm0, %v205_v6  ;;  %842 = vmatmul.msk.f32.gmra.mxu3 %vm242_vm0, %v221_v7  ;;  %v178_v28 = vld [vmem:[%s1055_s5 + $0x30] sm:$0xff]  ;;  %v179_v32 = vld [vmem:[%s1055_s5 + $0x38] sm:$0xff]  ;;  %v180_v36 = vld [vmem:[%s1055_s5 + $0x40] sm:$0xff] }
  0x21   : > { %794 = vmatmul.msk.f32.gmra.mxu0 %vm242_vm0, %v173_v8  ;;  %v194_v29 = vld [vmem:[%s1055_s5 + $0xb0] sm:$0xff]  ;;  %v195_v33 = vld [vmem:[%s1055_s5 + $0xb8] sm:$0xff]  ;;  %v196_v37 = vld [vmem:[%s1055_s5 + $0xc0] sm:$0xff] }
  0x22   : > { %810 = vmatmul.msk.f32.gmra.mxu1 %vm242_vm0, %v189_v9  ;;  %v213_v38 = vld [vmem:[%s1055_s5 + $0x148] sm:$0xff]  ;;  %v214_v42 = vld [vmem:[%s1055_s5 + $0x150] sm:$0xff]  ;;  %v215_v46 = vld [vmem:[%s1055_s5 + $0x158] sm:$0xff] }
  0x23   : > { %v229_v39 = vld [vmem:[%s1055_s5 + $0x1c8] sm:$0xff]  ;;  %v230_v43 = vld [vmem:[%s1055_s5 + $0x1d0] sm:$0xff]  ;;  %v231_v47 = vld [vmem:[%s1055_s5 + $0x1d8] sm:$0xff] }
  0x24   : > { %v181_v40 = vld [vmem:[%s1055_s5 + $0x48] sm:$0xff]  ;;  %v182_v44 = vld [vmem:[%s1055_s5 + $0x50] sm:$0xff]  ;;  %v183_v48 = vld [vmem:[%s1055_s5 + $0x58] sm:$0xff] }
  0x25   : > { %v197_v41 = vld [vmem:[%s1055_s5 + $0xc8] sm:$0xff]  ;;  %v198_v45 = vld [vmem:[%s1055_s5 + $0xd0] sm:$0xff]  ;;  %v199_v49 = vld [vmem:[%s1055_s5 + $0xd8] sm:$0xff] }
  0x26   : > { %v216_v50 = vld [vmem:[%s1055_s5 + $0x160] sm:$0xff]  ;;  %v217_v54 = vld [vmem:[%s1055_s5 + $0x168] sm:$0xff]  ;;  %v218_v58 = vld [vmem:[%s1055_s5 + $0x170] sm:$0xff] }
  0x27   : > { %v232_v51 = vld [vmem:[%s1055_s5 + $0x1e0] sm:$0xff]  ;;  %v233_v55 = vld [vmem:[%s1055_s5 + $0x1e8] sm:$0xff]  ;;  %v234_v59 = vld [vmem:[%s1055_s5 + $0x1f0] sm:$0xff] }
  0x28   : > { %827 = vmatmul.msk.f32.gmra.mxu2 %vm242_vm0, %v206_v10  ;;  %843 = vmatmul.msk.f32.gmra.mxu3 %vm242_vm0, %v222_v11  ;;  %v184_v52 = vld [vmem:[%s1055_s5 + $0x60] sm:$0xff]  ;;  %v185_v56 = vld [vmem:[%s1055_s5 + $0x68] sm:$0xff]  ;;  %v186_v60 = vld [vmem:[%s1055_s5 + $0x70] sm:$0xff] }
  0x29   : > { %795 = vmatmul.msk.f32.gmra.mxu0 %vm242_vm0, %v174_v12  ;;  %v200_v53 = vld [vmem:[%s1055_s5 + $0xe0] sm:$0xff]  ;;  %v201_v57 = vld [vmem:[%s1055_s5 + $0xe8] sm:$0xff]  ;;  %v202_v61 = vld [vmem:[%s1055_s5 + $0xf0] sm:$0xff] }
  0x2a   : > { %811 = vmatmul.msk.f32.gmra.mxu1 %vm242_vm0, %v190_v13  ;;  %v219_v62 = vld [vmem:[%s1055_s5 + $0x178] sm:$0xff]  ;;  %v1191_v2 = vld [vmem:[%s1359_s2] ss:$0 sm:$0xff] }
  0x2b   : > { %v235_v63 = vld [vmem:[%s1055_s5 + $0x1f8] sm:$0xff] }
  0x2c   : > { %v187_v0 = vld [vmem:[%s1055_s5 + $0x78] sm:$0xff] }
  0x2d   : > { %v203_v1 = vld [vmem:[%s1055_s5 + $0xf8] sm:$0xff] }
  0x30   : > { %828 = vmatmul.msk.f32.gmra.mxu2 %vm242_vm0, %v207_v14  ;;  %844 = vmatmul.msk.f32.gmra.mxu3 %vm242_vm0, %v223_v15 }
  0x31   : > { %796 = vmatmul.msk.f32.gmra.mxu0 %vm242_vm0, %v175_v16 }
  0x32   : > { %812 = vmatmul.msk.f32.gmra.mxu1 %vm242_vm0, %v191_v17 }
  0x38   : > { %829 = vmatmul.msk.f32.gmra.mxu2 %vm242_vm0, %v208_v18  ;;  %845 = vmatmul.msk.f32.gmra.mxu3 %vm242_vm0, %v224_v19 }
  0x39   : > { %797 = vmatmul.msk.f32.gmra.mxu0 %vm242_vm0, %v176_v20 }
  0x3a   : > { %813 = vmatmul.msk.f32.gmra.mxu1 %vm242_vm0, %v192_v21 }
  0x40   : > { %830 = vmatmul.msk.f32.gmra.mxu2 %vm242_vm0, %v209_v22  ;;  %846 = vmatmul.msk.f32.gmra.mxu3 %vm242_vm0, %v225_v23 }
  0x41   : > { %798 = vmatmul.msk.f32.gmra.mxu0 %vm242_vm0, %v177_v24 }
  0x42   : > { %814 = vmatmul.msk.f32.gmra.mxu1 %vm242_vm0, %v193_v25 }
  0x48   : > { %831 = vmatmul.msk.f32.gmra.mxu2 %vm242_vm0, %v210_v26  ;;  %847 = vmatmul.msk.f32.gmra.mxu3 %vm242_vm0, %v226_v27 }
  0x49   : > { %799 = vmatmul.msk.f32.gmra.mxu0 %vm242_vm0, %v178_v28 }
  0x4a   : > { %815 = vmatmul.msk.f32.gmra.mxu1 %vm242_vm0, %v194_v29 }
  0x50   : > { %832 = vmatmul.msk.f32.gmra.mxu2 %vm242_vm0, %v211_v30  ;;  %848 = vmatmul.msk.f32.gmra.mxu3 %vm242_vm0, %v227_v31 }
  0x51   : > { %800 = vmatmul.msk.f32.gmra.mxu0 %vm242_vm0, %v179_v32 }
  0x52   : > { %816 = vmatmul.msk.f32.gmra.mxu1 %vm242_vm0, %v195_v33 }
  0x58   : > { %833 = vmatmul.msk.f32.gmra.mxu2 %vm242_vm0, %v212_v34  ;;  %849 = vmatmul.msk.f32.gmra.mxu3 %vm242_vm0, %v228_v35 }
  0x59   : > { %801 = vmatmul.msk.f32.gmra.mxu0 %vm242_vm0, %v180_v36 }
  0x5a   : > { %817 = vmatmul.msk.f32.gmra.mxu1 %vm242_vm0, %v196_v37 }
  0x60   : > { %834 = vmatmul.msk.f32.gmra.mxu2 %vm242_vm0, %v213_v38  ;;  %850 = vmatmul.msk.f32.gmra.mxu3 %vm242_vm0, %v229_v39 }
  0x61   : > { %802 = vmatmul.msk.f32.gmra.mxu0 %vm242_vm0, %v181_v40 }
  0x62   : > { %818 = vmatmul.msk.f32.gmra.mxu1 %vm242_vm0, %v197_v41 }
  0x68   : > { %835 = vmatmul.msk.f32.gmra.mxu2 %vm242_vm0, %v214_v42  ;;  %851 = vmatmul.msk.f32.gmra.mxu3 %vm242_vm0, %v230_v43 }
  0x69   : > { %803 = vmatmul.msk.f32.gmra.mxu0 %vm242_vm0, %v182_v44 }
  0x6a   : > { %819 = vmatmul.msk.f32.gmra.mxu1 %vm242_vm0, %v198_v45 }
  0x70   : > { %836 = vmatmul.msk.f32.gmra.mxu2 %vm242_vm0, %v215_v46  ;;  %852 = vmatmul.msk.f32.gmra.mxu3 %vm242_vm0, %v231_v47 }
  0x71   : > { %804 = vmatmul.msk.f32.gmra.mxu0 %vm242_vm0, %v183_v48 }
  0x72   : > { %820 = vmatmul.msk.f32.gmra.mxu1 %vm242_vm0, %v199_v49 }
  0x78   : > { %837 = vmatmul.msk.f32.gmra.mxu2 %vm242_vm0, %v216_v50  ;;  %853 = vmatmul.msk.f32.gmra.mxu3 %vm242_vm0, %v232_v51 }
  0x79   : > { %805 = vmatmul.msk.f32.gmra.mxu0 %vm242_vm0, %v184_v52 }
  0x7a   : > { %821 = vmatmul.msk.f32.gmra.mxu1 %vm242_vm0, %v200_v53 }
  0x80   : > { %838 = vmatmul.msk.f32.gmra.mxu2 %vm242_vm0, %v217_v54  ;;  %854 = vmatmul.msk.f32.gmra.mxu3 %vm242_vm0, %v233_v55 }
  0x81   : > { %806 = vmatmul.msk.f32.gmra.mxu0 %vm242_vm0, %v185_v56 }
  0x82   : > { %822 = vmatmul.msk.f32.gmra.mxu1 %vm242_vm0, %v201_v57 }
  0x88   : > { %839 = vmatmul.msk.f32.gmra.mxu2 %vm242_vm0, %v218_v58  ;;  %855 = vmatmul.msk.f32.gmra.mxu3 %vm242_vm0, %v234_v59 }
  0x89   : > { %807 = vmatmul.msk.f32.gmra.mxu0 %vm242_vm0, %v186_v60 }
  0x8a   : > { %823 = vmatmul.msk.f32.gmra.mxu1 %vm242_vm0, %v202_v61 }
  0x90   : > { %840 = vmatmul.msk.f32.gmra.mxu2 %vm242_vm0, %v219_v62  ;;  %856 = vmatmul.msk.f32.gmra.mxu3 %vm242_vm0, %v235_v63 }
  0x91   : > { %808 = vmatmul.msk.f32.gmra.mxu0 %vm242_vm0, %v187_v0 }
  0x92   : > { %824 = vmatmul.msk.f32.gmra.mxu1 %vm242_vm0, %v203_v1 }
  0x96   : > { %v452_v3 = vpop.f32.mrf.mxu0 }
  0x97   : > { %v500_v4 = vpop.f32.mrf.mxu1  ;;  %v453_v5 = vadd.f32 %v1191_v2, %v452_v3 }
  0x98   : > { %v501_v6 = vadd.f32 %v1191_v2, %v500_v4 }
  0x99   : > { %644 = vst [vmem:[%s1195_s10] sm:$0xff] %v453_v5 }
  0x9a   : > { %660 = vst [vmem:[%s1195_s10 + $0x80] sm:$0xff] %v501_v6 }
  0x9b   : > { %v548_v7 = vpop.f32.mrf.mxu2  ;;  %v596_v8 = vpop.f32.mrf.mxu3 }
  0x9c   : > { %v549_v9 = vadd.f32 %v1191_v2, %v548_v7  ;;  %v597_v10 = vadd.f32 %v1191_v2, %v596_v8 }
  0x9e   : > { %676 = vst [vmem:[%s1195_s10 + $0x100] sm:$0xff] %v549_v9  ;;  %v455_v11 = vpop.f32.mrf.mxu0 }
  0x9f   : > { %v503_v12 = vpop.f32.mrf.mxu1  ;;  %692 = vst [vmem:[%s1195_s10 + $0x180] sm:$0xff] %v597_v10  ;;  %v456_v13 = vadd.f32 %v1191_v2, %v455_v11 }
  0xa0   : > { %v504_v14 = vadd.f32 %v1191_v2, %v503_v12 }
  0xa1   : > { %645 = vst [vmem:[%s1195_s10 + $0x8] sm:$0xff] %v456_v13 }
  0xa2   : > { %661 = vst [vmem:[%s1195_s10 + $0x88] sm:$0xff] %v504_v14 }
  0xa3   : > { %v551_v15 = vpop.f32.mrf.mxu2  ;;  %v599_v16 = vpop.f32.mrf.mxu3 }
  0xa4   : > { %v552_v17 = vadd.f32 %v1191_v2, %v551_v15  ;;  %v600_v18 = vadd.f32 %v1191_v2, %v599_v16 }
  0xa6   : > { %677 = vst [vmem:[%s1195_s10 + $0x108] sm:$0xff] %v552_v17  ;;  %v458_v19 = vpop.f32.mrf.mxu0 }
  0xa7   : > { %v506_v20 = vpop.f32.mrf.mxu1  ;;  %693 = vst [vmem:[%s1195_s10 + $0x188] sm:$0xff] %v600_v18  ;;  %v459_v21 = vadd.f32 %v1191_v2, %v458_v19 }
  0xa8   : > { %v507_v22 = vadd.f32 %v1191_v2, %v506_v20 }
  0xa9   : > { %646 = vst [vmem:[%s1195_s10 + $0x10] sm:$0xff] %v459_v21 }
  0xaa   : > { %662 = vst [vmem:[%s1195_s10 + $0x90] sm:$0xff] %v507_v22 }
  0xab   : > { %v554_v23 = vpop.f32.mrf.mxu2  ;;  %v602_v24 = vpop.f32.mrf.mxu3 }
  0xac   : > { %v555_v25 = vadd.f32 %v1191_v2, %v554_v23  ;;  %v603_v26 = vadd.f32 %v1191_v2, %v602_v24 }
  0xae   : > { %678 = vst [vmem:[%s1195_s10 + $0x110] sm:$0xff] %v555_v25  ;;  %v461_v27 = vpop.f32.mrf.mxu0 }
  0xaf   : > { %v509_v28 = vpop.f32.mrf.mxu1  ;;  %694 = vst [vmem:[%s1195_s10 + $0x190] sm:$0xff] %v603_v26  ;;  %v462_v29 = vadd.f32 %v1191_v2, %v461_v27 }
  0xb0   : > { %v510_v30 = vadd.f32 %v1191_v2, %v509_v28 }
  0xb1   : > { %647 = vst [vmem:[%s1195_s10 + $0x18] sm:$0xff] %v462_v29 }
  0xb2   : > { %663 = vst [vmem:[%s1195_s10 + $0x98] sm:$0xff] %v510_v30 }
  0xb3   : > { %v557_v31 = vpop.f32.mrf.mxu2  ;;  %v605_v32 = vpop.f32.mrf.mxu3 }
  0xb4   : > { %v558_v33 = vadd.f32 %v1191_v2, %v557_v31  ;;  %v606_v34 = vadd.f32 %v1191_v2, %v605_v32 }
  0xb6   : > { %679 = vst [vmem:[%s1195_s10 + $0x118] sm:$0xff] %v558_v33  ;;  %v464_v35 = vpop.f32.mrf.mxu0 }
  0xb7   : > { %v512_v36 = vpop.f32.mrf.mxu1  ;;  %695 = vst [vmem:[%s1195_s10 + $0x198] sm:$0xff] %v606_v34  ;;  %v465_v37 = vadd.f32 %v1191_v2, %v464_v35 }
  0xb8   : > { %v513_v38 = vadd.f32 %v1191_v2, %v512_v36 }
  0xb9   : > { %648 = vst [vmem:[%s1195_s10 + $0x20] sm:$0xff] %v465_v37 }
  0xba   : > { %664 = vst [vmem:[%s1195_s10 + $0xa0] sm:$0xff] %v513_v38 }
  0xbb   : > { %v560_v39 = vpop.f32.mrf.mxu2  ;;  %v608_v40 = vpop.f32.mrf.mxu3 }
  0xbc   : > { %v561_v41 = vadd.f32 %v1191_v2, %v560_v39  ;;  %v609_v42 = vadd.f32 %v1191_v2, %v608_v40 }
  0xbe   : > { %680 = vst [vmem:[%s1195_s10 + $0x120] sm:$0xff] %v561_v41  ;;  %v467_v43 = vpop.f32.mrf.mxu0 }
  0xbf   : > { %v515_v44 = vpop.f32.mrf.mxu1  ;;  %696 = vst [vmem:[%s1195_s10 + $0x1a0] sm:$0xff] %v609_v42  ;;  %v468_v45 = vadd.f32 %v1191_v2, %v467_v43 }
  0xc0   : > { %v516_v46 = vadd.f32 %v1191_v2, %v515_v44 }
  0xc1   : > { %649 = vst [vmem:[%s1195_s10 + $0x28] sm:$0xff] %v468_v45 }
  0xc2   : > { %665 = vst [vmem:[%s1195_s10 + $0xa8] sm:$0xff] %v516_v46 }
  0xc3   : > { %v563_v47 = vpop.f32.mrf.mxu2  ;;  %v611_v48 = vpop.f32.mrf.mxu3 }
  0xc4   : > { %v564_v49 = vadd.f32 %v1191_v2, %v563_v47  ;;  %v612_v50 = vadd.f32 %v1191_v2, %v611_v48 }
  0xc6   : > { %681 = vst [vmem:[%s1195_s10 + $0x128] sm:$0xff] %v564_v49  ;;  %v470_v51 = vpop.f32.mrf.mxu0 }
  0xc7   : > { %v518_v52 = vpop.f32.mrf.mxu1  ;;  %697 = vst [vmem:[%s1195_s10 + $0x1a8] sm:$0xff] %v612_v50  ;;  %v471_v53 = vadd.f32 %v1191_v2, %v470_v51 }
  0xc8   : > { %v519_v54 = vadd.f32 %v1191_v2, %v518_v52 }
  0xc9   : > { %650 = vst [vmem:[%s1195_s10 + $0x30] sm:$0xff] %v471_v53 }
  0xca   : > { %666 = vst [vmem:[%s1195_s10 + $0xb0] sm:$0xff] %v519_v54 }
  0xcb   : > { %v566_v55 = vpop.f32.mrf.mxu2  ;;  %v614_v56 = vpop.f32.mrf.mxu3 }
  0xcc   : > { %v567_v57 = vadd.f32 %v1191_v2, %v566_v55  ;;  %v615_v58 = vadd.f32 %v1191_v2, %v614_v56 }
  0xce   : > { %682 = vst [vmem:[%s1195_s10 + $0x130] sm:$0xff] %v567_v57  ;;  %v473_v59 = vpop.f32.mrf.mxu0 }
  0xcf   : > { %v521_v60 = vpop.f32.mrf.mxu1  ;;  %698 = vst [vmem:[%s1195_s10 + $0x1b0] sm:$0xff] %v615_v58  ;;  %v474_v61 = vadd.f32 %v1191_v2, %v473_v59 }
  0xd0   : > { %v522_v62 = vadd.f32 %v1191_v2, %v521_v60 }
  0xd1   : > { %651 = vst [vmem:[%s1195_s10 + $0x38] sm:$0xff] %v474_v61 }
  0xd2   : > { %667 = vst [vmem:[%s1195_s10 + $0xb8] sm:$0xff] %v522_v62 }
  0xd3   : > { %v569_v63 = vpop.f32.mrf.mxu2  ;;  %v617_v0 = vpop.f32.mrf.mxu3 }
  0xd4   : > { %v570_v1 = vadd.f32 %v1191_v2, %v569_v63  ;;  %v618_v3 = vadd.f32 %v1191_v2, %v617_v0 }
  0xd6   : > { %683 = vst [vmem:[%s1195_s10 + $0x138] sm:$0xff] %v570_v1  ;;  %v476_v4 = vpop.f32.mrf.mxu0 }
  0xd7   : > { %v524_v5 = vpop.f32.mrf.mxu1  ;;  %699 = vst [vmem:[%s1195_s10 + $0x1b8] sm:$0xff] %v618_v3  ;;  %v477_v6 = vadd.f32 %v1191_v2, %v476_v4 }
  0xd8   : > { %v525_v7 = vadd.f32 %v1191_v2, %v524_v5 }
  0xd9   : > { %652 = vst [vmem:[%s1195_s10 + $0x40] sm:$0xff] %v477_v6 }
  0xda   : > { %668 = vst [vmem:[%s1195_s10 + $0xc0] sm:$0xff] %v525_v7 }
  0xdb   : > { %v572_v8 = vpop.f32.mrf.mxu2  ;;  %v620_v9 = vpop.f32.mrf.mxu3 }
  0xdc   : > { %v573_v10 = vadd.f32 %v1191_v2, %v572_v8  ;;  %v621_v11 = vadd.f32 %v1191_v2, %v620_v9 }
  0xde   : > { %684 = vst [vmem:[%s1195_s10 + $0x140] sm:$0xff] %v573_v10  ;;  %v479_v12 = vpop.f32.mrf.mxu0 }
  0xdf   : > { %v527_v13 = vpop.f32.mrf.mxu1  ;;  %700 = vst [vmem:[%s1195_s10 + $0x1c0] sm:$0xff] %v621_v11  ;;  %v480_v14 = vadd.f32 %v1191_v2, %v479_v12 }
  0xe0   : > { %v528_v15 = vadd.f32 %v1191_v2, %v527_v13 }
  0xe1   : > { %653 = vst [vmem:[%s1195_s10 + $0x48] sm:$0xff] %v480_v14 }
  0xe2   : > { %669 = vst [vmem:[%s1195_s10 + $0xc8] sm:$0xff] %v528_v15 }
  0xe3   : > { %v575_v16 = vpop.f32.mrf.mxu2  ;;  %v623_v17 = vpop.f32.mrf.mxu3 }
  0xe4   : > { %v576_v18 = vadd.f32 %v1191_v2, %v575_v16  ;;  %v624_v19 = vadd.f32 %v1191_v2, %v623_v17 }
  0xe6   : > { %685 = vst [vmem:[%s1195_s10 + $0x148] sm:$0xff] %v576_v18  ;;  %v482_v20 = vpop.f32.mrf.mxu0 }
  0xe7   : > { %v530_v21 = vpop.f32.mrf.mxu1  ;;  %701 = vst [vmem:[%s1195_s10 + $0x1c8] sm:$0xff] %v624_v19  ;;  %v483_v22 = vadd.f32 %v1191_v2, %v482_v20 }
  0xe8   : > { %v531_v23 = vadd.f32 %v1191_v2, %v530_v21 }
  0xe9   : > { %654 = vst [vmem:[%s1195_s10 + $0x50] sm:$0xff] %v483_v22 }
  0xea   : > { %670 = vst [vmem:[%s1195_s10 + $0xd0] sm:$0xff] %v531_v23 }
  0xeb   : > { %v578_v24 = vpop.f32.mrf.mxu2  ;;  %v626_v25 = vpop.f32.mrf.mxu3 }
  0xec   : > { %v579_v26 = vadd.f32 %v1191_v2, %v578_v24  ;;  %v627_v27 = vadd.f32 %v1191_v2, %v626_v25 }
  0xee   : > { %686 = vst [vmem:[%s1195_s10 + $0x150] sm:$0xff] %v579_v26  ;;  %v485_v28 = vpop.f32.mrf.mxu0 }
  0xef   : > { %v533_v29 = vpop.f32.mrf.mxu1  ;;  %702 = vst [vmem:[%s1195_s10 + $0x1d0] sm:$0xff] %v627_v27  ;;  %v486_v30 = vadd.f32 %v1191_v2, %v485_v28 }
  0xf0   : > { %v534_v31 = vadd.f32 %v1191_v2, %v533_v29 }
  0xf1   : > { %655 = vst [vmem:[%s1195_s10 + $0x58] sm:$0xff] %v486_v30 }
  0xf2   : > { %671 = vst [vmem:[%s1195_s10 + $0xd8] sm:$0xff] %v534_v31 }
  0xf3   : > { %v581_v32 = vpop.f32.mrf.mxu2  ;;  %v629_v33 = vpop.f32.mrf.mxu3 }
  0xf4   : > { %v582_v34 = vadd.f32 %v1191_v2, %v581_v32  ;;  %v630_v35 = vadd.f32 %v1191_v2, %v629_v33 }
  0xf6   : > { %687 = vst [vmem:[%s1195_s10 + $0x158] sm:$0xff] %v582_v34  ;;  %v488_v36 = vpop.f32.mrf.mxu0 }
  0xf7   : > { %v536_v37 = vpop.f32.mrf.mxu1  ;;  %703 = vst [vmem:[%s1195_s10 + $0x1d8] sm:$0xff] %v630_v35  ;;  %v489_v38 = vadd.f32 %v1191_v2, %v488_v36 }
  0xf8   : > { %v537_v39 = vadd.f32 %v1191_v2, %v536_v37 }
  0xf9   : > { %656 = vst [vmem:[%s1195_s10 + $0x60] sm:$0xff] %v489_v38 }
  0xfa   : > { %672 = vst [vmem:[%s1195_s10 + $0xe0] sm:$0xff] %v537_v39 }
  0xfb   : > { %v584_v40 = vpop.f32.mrf.mxu2  ;;  %v632_v41 = vpop.f32.mrf.mxu3 }
  0xfc   : > { %v585_v42 = vadd.f32 %v1191_v2, %v584_v40  ;;  %v633_v43 = vadd.f32 %v1191_v2, %v632_v41 }
  0xfe   : > { %688 = vst [vmem:[%s1195_s10 + $0x160] sm:$0xff] %v585_v42  ;;  %v491_v44 = vpop.f32.mrf.mxu0 }
  0xff   : > { %v539_v45 = vpop.f32.mrf.mxu1  ;;  %704 = vst [vmem:[%s1195_s10 + $0x1e0] sm:$0xff] %v633_v43  ;;  %v492_v46 = vadd.f32 %v1191_v2, %v491_v44 }
 0x100   : > { %v540_v47 = vadd.f32 %v1191_v2, %v539_v45 }
 0x101   : > { %657 = vst [vmem:[%s1195_s10 + $0x68] sm:$0xff] %v492_v46 }
 0x102   : > { %673 = vst [vmem:[%s1195_s10 + $0xe8] sm:$0xff] %v540_v47 }
 0x103   : > { %v587_v48 = vpop.f32.mrf.mxu2  ;;  %v635_v49 = vpop.f32.mrf.mxu3 }
 0x104   : > { %v588_v50 = vadd.f32 %v1191_v2, %v587_v48  ;;  %v636_v51 = vadd.f32 %v1191_v2, %v635_v49 }
 0x106   : > { %689 = vst [vmem:[%s1195_s10 + $0x168] sm:$0xff] %v588_v50  ;;  %v494_v52 = vpop.f32.mrf.mxu0 }
 0x107   : > { %v542_v53 = vpop.f32.mrf.mxu1  ;;  %705 = vst [vmem:[%s1195_s10 + $0x1e8] sm:$0xff] %v636_v51  ;;  %v495_v54 = vadd.f32 %v1191_v2, %v494_v52 }
 0x108   : > { %v543_v55 = vadd.f32 %v1191_v2, %v542_v53 }
 0x109   : > { %658 = vst [vmem:[%s1195_s10 + $0x70] sm:$0xff] %v495_v54 }
 0x10a   : > { %674 = vst [vmem:[%s1195_s10 + $0xf0] sm:$0xff] %v543_v55 }
 0x10b   : > { %v590_v56 = vpop.f32.mrf.mxu2  ;;  %v638_v57 = vpop.f32.mrf.mxu3 }
 0x10c   : > { %v591_v58 = vadd.f32 %v1191_v2, %v590_v56  ;;  %v639_v59 = vadd.f32 %v1191_v2, %v638_v57 }
 0x10e   : > { %690 = vst [vmem:[%s1195_s10 + $0x170] sm:$0xff] %v591_v58  ;;  %v497_v60 = vpop.f32.mrf.mxu0 }
 0x10f   : > { %v545_v61 = vpop.f32.mrf.mxu1  ;;  %706 = vst [vmem:[%s1195_s10 + $0x1f0] sm:$0xff] %v639_v59  ;;  %v498_v62 = vadd.f32 %v1191_v2, %v497_v60 }
 0x110   : > { %v546_v63 = vadd.f32 %v1191_v2, %v545_v61 }
 0x111   : > { %659 = vst [vmem:[%s1195_s10 + $0x78] sm:$0xff] %v498_v62 }
 0x112   : > { %675 = vst [vmem:[%s1195_s10 + $0xf8] sm:$0xff] %v546_v63 }
 0x113   : > { %v593_v0 = vpop.f32.mrf.mxu2  ;;  %v641_v1 = vpop.f32.mrf.mxu3 }
 0x114   : > { %v594_v3 = vadd.f32 %v1191_v2, %v593_v0  ;;  %v642_v4 = vadd.f32 %v1191_v2, %v641_v1 }
 0x116   : > { %691 = vst [vmem:[%s1195_s10 + $0x178] sm:$0xff] %v594_v3 }
 0x117   : > { %707 = vst [vmem:[%s1195_s10 + $0x1f8] sm:$0xff] %v642_v4 }
 0x118   : > { %938 = shalt.err (!%p935_p3)
}
 0x119   : > { %s975_s6 = smov 128   ;;  %s976_s7 = smov 8  }
 0x11a   : > { %869 = dma.vmem_to_hbm [thread:$0]  (%p1035_p5), %s722_s16, 8192, %s724_s24, %s709_s25, %s975_s6, %s975_s6, %s976_s7  }
 0x11b PF: > { %p875_p4 = scmp.ge.s32.totalorder %s973_s15, 2  ;;  %s738_s8 = sand.u32 1, %s961_s12  }
 0x11c   : > { %s739_s9 = scalar_lea.sflag [#allocation3], %s738_s8 }
 0x11d   : > { %p872_p7 = pnand %p875_p4, %p1039_p6 }
 0x11f   : > { %p873_p8 = pneg %p872_p7 }
 0x121   : > { %956 = dma.done.wait (%p873_p8), %s739_s9, 8192  }
 0x122   : > { %958 = vsyncadd (%p873_p8), %s739_s9, 4294959104  ;;  %p13_p9 = scmp.ge.s32.totalorder %s1022_s18, 4   ;;  %s1363_s12 = smov %s965_s13 }
 0x123   : > { %s1364_s13 = smov %s969_s14  ;;  %s1365_s14 = smov %s1033_s21 }
 0x124   : > { %s1366_s15 = smov %s1022_s18  ;;  %15 = sbr.rel (!%p13_p9) target bundleno = 3 (0x3), region = 67 }
 0x129   :  { %745 = vsyncpa [#allocation3], 1 }
 0x12a   :  { %747 = vsyncpa [#allocation3 + $0x1], 1 }

</bundles_post_ra>
